<compile_context>
chip_gen: v5e
topology: v5e:2x2
jax: 0.10.0
libtpu: 0.0.40
codegen_flags: <defaults>
</compile_context>

<pallas_src>
import functools

import jax
import jax.numpy as jnp
from jax.experimental import pallas as pl
from jax.experimental.pallas import tpu as pltpu


def pointsnet_kernel(xt_ref, w1t_ref, b1t_ref, w2t_ref, b2t_ref, o_ref):
    xt = xt_ref[...]            # (2, TILE_B)   batch on lanes
    w1t = w1t_ref[...]          # (32, 2)
    # fc1 as VPU broadcast-FMA (K=2 is too small to be worth the MXU):
    #   h = W1^T @ x^T + b1^T  ->  (32, TILE_B)
    h = (w1t[:, 0:1] * xt[0:1, :]
         + w1t[:, 1:2] * xt[1:2, :]
         + b1t_ref[...])
    # ReLU
    h = jnp.maximum(h, 0.0)
    # Dropout(0.5): identity at inference time (PyTorch eval semantics).
    # fc2 on the MXU: (3, 32) @ (32, TILE_B) -> (3, TILE_B), lane-dense output.
    out = jnp.dot(w2t_ref[...], h, preferred_element_type=jnp.float32)
    o_ref[...] = (out + b2t_ref[...]).astype(o_ref.dtype)


@functools.partial(jax.jit, static_argnames=("tile_b",))
def pointsnet_forward(x, w1, b1, w2, b2, *, tile_b=2048):
    """x: (B, 2) f32. w1: (2,32), b1: (1,32), w2: (32,3), b2: (1,3). Returns (B, 3)."""
    B = x.shape[0]
    # Pad B up to a multiple of tile_b (tile_b is a multiple of 128 -> lane aligned).
    assert tile_b % 128 == 0
    B_pad = max(tile_b, ((B + tile_b - 1) // tile_b) * tile_b)
    x_pad = jnp.pad(x.astype(jnp.float32), ((0, B_pad - B), (0, 0)))

    # Transposed, lane-dense layout (layout plumbing done outside the kernel).
    xt = x_pad.T                                   # (2, B_pad)
    w1t = w1.T                                     # (32, 2)
    b1t = b1.reshape(32, 1)                        # (32, 1)
    w2t = w2.T                                     # (3, 32)
    b2t = b2.reshape(3, 1)                         # (3, 1)

    n_tiles = B_pad // tile_b
    weight_bytes = (w1t.size + b1t.size + w2t.size + b2t.size) * 4
    cost = pl.CostEstimate(
        flops=320 * B_pad,                 # 2*(2*32) + 2*(32*3) per point
        transcendentals=0,
        bytes_accessed=20 * B_pad + weight_bytes,   # 8 B in + 12 B out per point
    )

    out_t = pl.pallas_call(
        pointsnet_kernel,
        out_shape=jax.ShapeDtypeStruct((3, B_pad), jnp.float32),
        grid_spec=pl.GridSpec(
            grid=(n_tiles,),
            in_specs=[
                pl.BlockSpec((2, tile_b), lambda i: (0, i)),   # x tile, pipelined
                pl.BlockSpec((32, 2), lambda i: (0, 0)),       # weights VMEM-resident
                pl.BlockSpec((32, 1), lambda i: (0, 0)),
                pl.BlockSpec((3, 32), lambda i: (0, 0)),
                pl.BlockSpec((3, 1), lambda i: (0, 0)),
            ],
            out_specs=pl.BlockSpec((3, tile_b), lambda i: (0, i)),
        ),
        compiler_params=pltpu.CompilerParams(
            dimension_semantics=("parallel",)),
        cost_estimate=cost,
    )(xt, w1t, b1t, w2t, b2t)

    # Back to (B, 3), dropping padded columns.
    return out_t[:, :B].T


def init_params(key):
    """Deterministic init mimicking PyTorch nn.Linear default U[-1/sqrt(fan_in), 1/sqrt(fan_in)]."""
    k1, k2, k3, k4 = jax.random.split(key, 4)
    bound1 = 1.0 / jnp.sqrt(2.0)   # fc1 fan_in = 2
    bound2 = 1.0 / jnp.sqrt(32.0)  # fc2 fan_in = 32
    w1 = jax.random.uniform(k1, (2, 32), jnp.float32, -bound1, bound1)
    b1 = jax.random.uniform(k2, (1, 32), jnp.float32, -bound1, bound1)
    w2 = jax.random.uniform(k3, (32, 3), jnp.float32, -bound2, bound2)
    b2 = jax.random.uniform(k4, (1, 3), jnp.float32, -bound2, bound2)
    return w1, b1, w2, b2


if __name__ == "__main__":
    key = jax.random.PRNGKey(0)
    pkey, xkey = jax.random.split(key)
    w1, b1, w2, b2 = init_params(pkey)

    # Small batch of 2-D points (matches the spiral-points use case: (x, y) pairs).
    B = 8
    x = jax.random.normal(xkey, (B, 2), jnp.float32)

    out = pointsnet_forward(x, w1, b1, w2, b2)
    out = jax.block_until_ready(out)

    # Reference check in plain JAX (dropout is identity in eval mode).
    ref = jnp.maximum(x @ w1 + b1, 0.0) @ w2 + b2
    assert out.shape == (B, 3)
    assert jnp.allclose(out, ref, atol=1e-5, rtol=1e-5)

    # Also exercise a multi-tile, ragged batch to check padding/tiling path.
    B2 = 5000
    x2 = jax.random.normal(xkey, (B2, 2), jnp.float32)
    out2 = jax.block_until_ready(pointsnet_forward(x2, w1, b1, w2, b2))
    ref2 = jnp.maximum(x2 @ w1 + b1, 0.0) @ w2 + b2
    assert out2.shape == (B2, 3)
    assert jnp.allclose(out2, ref2, atol=1e-5, rtol=1e-5)

    print("KERNEL_OK")
</pallas_src>

<mosaic_0001>
module attributes {stable_mosaic.version = 11 : i64} {
  func.func @pointsnet_kernel(%arg0: i32, %arg1: memref<2x2048xf32, #tpu.memory_space<vmem>>, %arg2: memref<32x2xf32, #tpu.memory_space<vmem>>, %arg3: memref<32x1xf32, #tpu.memory_space<vmem>>, %arg4: memref<3x32xf32, #tpu.memory_space<vmem>>, %arg5: memref<3x1xf32, #tpu.memory_space<vmem>>, %arg6: memref<3x2048xf32, #tpu.memory_space<vmem>>) attributes {dimension_semantics = [#tpu.dimension_semantics<parallel>], iteration_bounds = array<i64: 1>, scalar_prefetch = 0 : i64, scratch_operands = 0 : i64, tpu.core_type = #tpu.core_type<tc>, window_params = [{transform_indices = @transform_0, window_bounds = array<i64: 2, 2048>}, {pipeline_mode = #tpu.pipeline_mode<synchronous>, transform_indices = @transform_1, window_bounds = array<i64: 32, 2>}, {pipeline_mode = #tpu.pipeline_mode<synchronous>, transform_indices = @transform_2, window_bounds = array<i64: 32, 1>}, {pipeline_mode = #tpu.pipeline_mode<synchronous>, transform_indices = @transform_3, window_bounds = array<i64: 3, 32>}, {pipeline_mode = #tpu.pipeline_mode<synchronous>, transform_indices = @transform_4, window_bounds = array<i64: 3, 1>}, {transform_indices = @transform_5, window_bounds = array<i64: 3, 2048>}]} {
    %c0 = arith.constant 0 : index
    %c0_0 = arith.constant 0 : index
    %0 = vector.load %arg1[%c0, %c0_0] : memref<2x2048xf32, #tpu.memory_space<vmem>>, vector<2x2048xf32>
    %c0_1 = arith.constant 0 : index
    %c0_2 = arith.constant 0 : index
    %1 = vector.load %arg2[%c0_1, %c0_2] : memref<32x2xf32, #tpu.memory_space<vmem>>, vector<32x2xf32>
    %2 = vector.extract_strided_slice %1 {offsets = [0, 0], sizes = [32, 1], strides = [1, 1]} : vector<32x2xf32> to vector<32x1xf32>
    %3 = vector.extract_strided_slice %0 {offsets = [0, 0], sizes = [1, 2048], strides = [1, 1]} : vector<2x2048xf32> to vector<1x2048xf32>
    %4 = vector.broadcast %2 : vector<32x1xf32> to vector<32x2048xf32>
    %5 = vector.broadcast %3 : vector<1x2048xf32> to vector<32x2048xf32>
    %6 = arith.mulf %4, %5 : vector<32x2048xf32>
    %7 = vector.extract_strided_slice %1 {offsets = [0, 1], sizes = [32, 1], strides = [1, 1]} : vector<32x2xf32> to vector<32x1xf32>
    %8 = vector.extract_strided_slice %0 {offsets = [1, 0], sizes = [1, 2048], strides = [1, 1]} : vector<2x2048xf32> to vector<1x2048xf32>
    %9 = vector.broadcast %7 : vector<32x1xf32> to vector<32x2048xf32>
    %10 = vector.broadcast %8 : vector<1x2048xf32> to vector<32x2048xf32>
    %11 = arith.mulf %9, %10 : vector<32x2048xf32>
    %12 = arith.addf %6, %11 : vector<32x2048xf32>
    %c0_3 = arith.constant 0 : index
    %c0_4 = arith.constant 0 : index
    %13 = vector.load %arg3[%c0_3, %c0_4] : memref<32x1xf32, #tpu.memory_space<vmem>>, vector<32x1xf32>
    %14 = vector.broadcast %13 : vector<32x1xf32> to vector<32x2048xf32>
    %15 = arith.addf %12, %14 : vector<32x2048xf32>
    %cst = arith.constant 0.000000e+00 : f32
    %16 = vector.broadcast %cst : f32 to vector<32x2048xf32>
    %17 = arith.maximumf %15, %16 : vector<32x2048xf32>
    %c0_5 = arith.constant 0 : index
    %c0_6 = arith.constant 0 : index
    %18 = vector.load %arg4[%c0_5, %c0_6] : memref<3x32xf32, #tpu.memory_space<vmem>>, vector<3x32xf32>
    %cst_7 = arith.constant dense<0.000000e+00> : vector<3x2048xf32>
    %19 = tpu.matmul %18, %17, %cst_7 {dimension_numbers = #tpu.dot_dimension_numbers<[1], [0], [0], [1], [0, 0, 1, 1], [], []>} : vector<3x32xf32>, vector<32x2048xf32>, vector<3x2048xf32> -> vector<3x2048xf32>
    %c0_8 = arith.constant 0 : index
    %c0_9 = arith.constant 0 : index
    %20 = vector.load %arg5[%c0_8, %c0_9] : memref<3x1xf32, #tpu.memory_space<vmem>>, vector<3x1xf32>
    %21 = vector.broadcast %20 : vector<3x1xf32> to vector<3x2048xf32>
    %22 = arith.addf %19, %21 : vector<3x2048xf32>
    %c0_10 = arith.constant 0 : index
    %c0_11 = arith.constant 0 : index
    %23 = vector.load %arg6[%c0_10, %c0_11] : memref<3x2048xf32, #tpu.memory_space<vmem>>, vector<3x2048xf32>
    tpu.vector_store %arg6[%c0_10, %c0_11], %22 {strides = array<i32>} : memref<3x2048xf32, #tpu.memory_space<vmem>>, vector<3x2048xf32>,
    return
  }
  func.func @transform_0(%arg0: i32) -> (i32, i32) {
    %c0_i32 = arith.constant 0 : i32
    %c0_i32_0 = arith.constant 0 : i32
    return %c0_i32, %arg0 : i32, i32
  }
  func.func @transform_1(%arg0: i32) -> (i32, i32) {
    %c0_i32 = arith.constant 0 : i32
    %c0_i32_0 = arith.constant 0 : i32
    %c0_i32_1 = arith.constant 0 : i32
    return %c0_i32, %c0_i32_0 : i32, i32
  }
  func.func @transform_2(%arg0: i32) -> (i32, i32) {
    %c0_i32 = arith.constant 0 : i32
    %c0_i32_0 = arith.constant 0 : i32
    %c0_i32_1 = arith.constant 0 : i32
    return %c0_i32, %c0_i32_0 : i32, i32
  }
  func.func @transform_3(%arg0: i32) -> (i32, i32) {
    %c0_i32 = arith.constant 0 : i32
    %c0_i32_0 = arith.constant 0 : i32
    %c0_i32_1 = arith.constant 0 : i32
    return %c0_i32, %c0_i32_0 : i32, i32
  }
  func.func @transform_4(%arg0: i32) -> (i32, i32) {
    %c0_i32 = arith.constant 0 : i32
    %c0_i32_0 = arith.constant 0 : i32
    %c0_i32_1 = arith.constant 0 : i32
    return %c0_i32, %c0_i32_0 : i32, i32
  }
  func.func @transform_5(%arg0: i32) -> (i32, i32) {
    %c0_i32 = arith.constant 0 : i32
    %c0_i32_0 = arith.constant 0 : i32
    return %c0_i32, %arg0 : i32, i32
  }
}

</mosaic_0001>

<bundles_post_ra>
// kernel: pointsnet_forward.1
= control target key start
LH: loop header
LB: loop body
LE: loop exit
PB: predicated region body
PF: predicated region fallthrough
CT: control target
= control target key end

     0   :  { %v919_v0 = vmov 0   ;;  %v920_v4 = vmov 1   ;;  %vm515_vm0 = vcmask 261120   ;;  %vm863_vm1 = vcmask 1043456   ;;  %s1613_s1 = inlined_call_operand.vmem [shape: f32[32,2], index: 1, kind: input, shape index: {}]   ;;  %s1614_s2 = inlined_call_operand.vmem [shape: f32[32,1], index: 2, kind: input, shape index: {}]   ;;  %s1615_s4 = inlined_call_operand.vmem [shape: f32[3,1], index: 4, kind: input, shape index: {}]   ;;  %s1616_s0 = inlined_call_operand.vmem [shape: f32[2,2048], index: 0, kind: input, shape index: {}]   ;;  %s1617_s3 = inlined_call_operand.vmem [shape: f32[3,32], index: 3, kind: input, shape index: {}]   ;;  %s1618_s5 = inlined_call_operand.vmem [shape: f32[3,2048], index: 5, kind: output, shape index: {}]  }
   0x1   :  { %912 = vset.pattern.permute.xlu1 %v919_v0  ;;  %910 = vset.pattern.permute.xlu0 %v919_v0  ;;  %v27_v1 = vld [vmem:[%s1613_s1 + $0x18] sm:$0xff]  ;;  %v26_v2 = vld [vmem:[%s1613_s1 + $0x10] sm:$0xff]  ;;  %v25_v3 = vld [vmem:[%s1613_s1 + $0x8] sm:$0xff] }
   0x2   :  { %45 = vperm.xlu0 %910, %v27_v1   ;;  %40 = vperm.xlu1 %912, %v26_v2   ;;  %v24_v5 = vld [vmem:[%s1613_s1] sm:$0xff]  ;;  %v359_v6 = vld [vmem:[%s1614_s2 + $0x18] sm:$0xff]  ;;  %v358_v7 = vld [vmem:[%s1614_s2 + $0x10] sm:$0xff] }
   0x3   :  { %914 = vset.pattern.permute.xlu2 %v919_v0  ;;  %v356_v8 = vld [vmem:[%s1614_s2] sm:$0xff]  ;;  %v357_v9 = vld [vmem:[%s1614_s2 + $0x8] sm:$0xff]  ;;  %v22_v46 = vld [vmem:[%s1616_s0 + $0x10] sm:$0xff] }
   0x4   :  { %35 = vperm.xlu2 %914, %v25_v3   ;;  %v509_v10 = vld [vmem:[%s1615_s4] sm:$0x7]  ;;  %v21_v13 = vld [vmem:[%s1616_s0 + $0x8] sm:$0xff]  ;;  %v60_v57 = vperm.slane %v22_v46, 0  ;;  %v188_v58 = vperm.slane %v22_v46, 1 }
   0x5   :  { %v20_v12 = vld [vmem:[%s1616_s0] sm:$0xff]  ;;  %v56_v22 = vperm.slane %v21_v13, 0  ;;  %v184_v23 = vperm.slane %v21_v13, 1  ;;  %v57_v24 = vperm.slane %v21_v13, 2  ;;  %v185_v25 = vperm.slane %v21_v13, 3 }
   0x6   :  { %v52_v14 = vperm.slane %v20_v12, 0  ;;  %v53_v15 = vperm.slane %v20_v12, 2  ;;  %v54_v16 = vperm.slane %v20_v12, 4  ;;  %v180_v17 = vperm.slane %v20_v12, 1 }
   0x7   :  { %v181_v18 = vperm.slane %v20_v12, 3  ;;  %v182_v19 = vperm.slane %v20_v12, 5  ;;  %v55_v20 = vperm.slane %v20_v12, 6  ;;  %v183_v21 = vperm.slane %v20_v12, 7 }
   0x8   :  { %v58_v26 = vperm.slane %v21_v13, 4  ;;  %v186_v27 = vperm.slane %v21_v13, 5  ;;  %v59_v28 = vperm.slane %v21_v13, 6  ;;  %v986_v29 = vperm.slane %v52_v14, 0 }
   0x9   :  { %v988_v30 = vperm.slane %v53_v15, 0  ;;  %v990_v31 = vperm.slane %v54_v16, 0  ;;  %v187_v32 = vperm.slane %v21_v13, 7  ;;  %v992_v33 = vperm.slane %v180_v17, 1 }
   0xa   :  { %911 = vset.pattern.permute.xlu0 %v920_v4  ;;  %913 = vset.pattern.permute.xlu1 %v920_v4  ;;  %v994_v34 = vperm.slane %v181_v18, 1  ;;  %v996_v35 = vperm.slane %v182_v19, 1  ;;  %v998_v36 = vperm.slane %v55_v20, 0  ;;  %v1002_v38 = vperm.slane %v183_v21, 1 }
   0xb   :  { %177 = vperm.xlu0 %911, %v27_v1   ;;  %173 = vperm.xlu1 %913, %v26_v2   ;;  %v1004_v39 = vperm.slane %v56_v22, 0  ;;  %v1006_v40 = vperm.slane %v184_v23, 1  ;;  %v1008_v41 = vperm.slane %v57_v24, 0  ;;  %v1010_v42 = vperm.slane %v185_v25, 1 }
   0xc   :  { %915 = vset.pattern.permute.xlu2 %v920_v4  ;;  %v1012_v43 = vperm.slane %v58_v26, 0  ;;  %v1014_v44 = vperm.slane %v186_v27, 1  ;;  %v1016_v45 = vperm.slane %v59_v28, 0  ;;  %v1027_v50 = vperm.slane %v187_v32, 1 }
   0xd   :  { %169 = vperm.xlu2 %915, %v25_v3   ;;  %v61_v2 = vperm.slane %v22_v46, 2  ;;  %v189_v3 = vperm.slane %v22_v46, 3  ;;  %v62_v4 = vperm.slane %v22_v46, 4 }
   0xf   :  { %v1061_v20 = vperm.slane %v61_v2, 0  ;;  %v1063_v21 = vperm.slane %v189_v3, 1  ;;  %v1065_v22 = vperm.slane %v62_v4, 0 }
  0x11   :  { %1646 = vst [vmem:[#allocation6_spill] sm:$0xff] %v1061_v20 }
  0x12   :  { %1647 = vst [vmem:[#allocation7_spill] sm:$0xff] %v1065_v22 }
  0x13   :  { %916 = vset.pattern.permute.xlu1 %v919_v0  ;;  %165 = vperm.xlu0 %911, %v24_v5  }
  0x14   :  { %377 = vperm.xlu1 %916, %v359_v6   ;;  %v63_v6 = vperm.slane %v22_v46, 6 }
  0x15   :  { %917 = vset.pattern.permute.xlu2 %v919_v0 }
  0x16   :  { %30 = vperm.xlu2 %917, %v24_v5   ;;  %v190_v5 = vperm.slane %v22_v46, 5  ;;  %v1069_v24 = vperm.slane %v63_v6, 0 }
  0x18   :  { %v1067_v23 = vperm.slane %v190_v5, 1  ;;  %1648 = vst [vmem:[#allocation8_spill] sm:$0xff] %v1069_v24 }
  0x1b   :  { %918 = vset.pattern.permute.xlu0 %v919_v0 }
  0x1c   :  { %372 = vperm.xlu1 %916, %v358_v7   ;;  %362 = vperm.xlu0 %918, %v356_v8   ;;  %v1055_v8 = vperm.slane %v60_v57, 0 }
  0x1e   :  { %367 = vperm.xlu2 %917, %v357_v9   ;;  %1644 = vst [vmem:[#allocation4_spill] sm:$0xff] %v1055_v8  ;;  %v1057_v9 = vperm.slane %v188_v58, 1 }
  0x24   :  { %512 = vperm.xlu1 %916, %v509_v10   ;;  %v191_v10 = vperm.slane %v22_v46, 7 }
  0x26   :  { %v1083_v28 = vperm.slane %v191_v10, 1 }
  0x5e   :  { %v978_v11 = vpop.permute.xlu2 %35 }
  0x5f   :  { %1642 = vst [vmem:[#allocation2_spill] sm:$0xff] %v978_v11  ;;  %v116_v47 = vmul.f32 %v986_v29, %v978_v11  ;;  %v117_v48 = vmul.f32 %v988_v30, %v978_v11  ;;  %v118_v49 = vmul.f32 %v990_v31, %v978_v11  ;;  %v119_v51 = vmul.f32 %v998_v36, %v978_v11 }
  0x60   :  { %v120_v52 = vmul.f32 %v1004_v39, %v978_v11  ;;  %v121_v53 = vmul.f32 %v1008_v41, %v978_v11  ;;  %v122_v54 = vmul.f32 %v1012_v43, %v978_v11  ;;  %v123_v56 = vmul.f32 %v1016_v45, %v978_v11 }
  0x67   :  { %v1000_v37 = vpop.permute.xlu2 %169 }
  0x68   :  { %1643 = vst [vmem:[#allocation3_spill] sm:$0xff] %v1000_v37  ;;  %v244_v55 = vmul.f32 %v992_v33, %v1000_v37  ;;  %v245_v59 = vmul.f32 %v994_v34, %v1000_v37  ;;  %v246_v60 = vmul.f32 %v996_v35, %v1000_v37  ;;  %v247_v61 = vmul.f32 %v1002_v38, %v1000_v37 }
  0x69   :  { %v248_v62 = vmul.f32 %v1006_v40, %v1000_v37  ;;  %v249_v63 = vmul.f32 %v1010_v42, %v1000_v37  ;;  %v250_v0 = vmul.f32 %v1014_v44, %v1000_v37  ;;  %v251_v1 = vmul.f32 %v1027_v50, %v1000_v37 }
  0x6a   :  { %v308_v7 = vadd.f32 %v244_v55, %v116_v47  ;;  %v309_v13 = vadd.f32 %v245_v59, %v117_v48  ;;  %v310_v14 = vadd.f32 %v246_v60, %v118_v49  ;;  %v311_v15 = vadd.f32 %v247_v61, %v119_v51 }
  0x6b   :  { %v312_v16 = vadd.f32 %v248_v62, %v120_v52  ;;  %v313_v17 = vadd.f32 %v249_v63, %v121_v53  ;;  %v314_v18 = vadd.f32 %v250_v0, %v122_v54  ;;  %v315_v19 = vadd.f32 %v251_v1, %v123_v56 }
  0x70   :  { %v1059_v12 = vpop.permute.xlu2 %30 }
  0x71   :  { %1645 = vst [vmem:[#allocation5_spill] sm:$0xff] %v1059_v12  ;;  %v1073_v25 = vmul.f32 %v986_v29, %v1059_v12  ;;  %v1077_v26 = vmul.f32 %v988_v30, %v1059_v12  ;;  %v1081_v27 = vmul.f32 %v990_v31, %v1059_v12  ;;  %v1091_v47 = vmul.f32 %v998_v36, %v1059_v12 }
  0x72   :  { %v1095_v48 = vmul.f32 %v1004_v39, %v1059_v12  ;;  %v1099_v49 = vmul.f32 %v1008_v41, %v1059_v12  ;;  %v1103_v51 = vmul.f32 %v1012_v43, %v1059_v12  ;;  %v1113_v55 = vmul.f32 %v1016_v45, %v1059_v12 }
  0x74   :  { %v1085_v32 = vpop.permute.xlu1 %40  ;;  %v1087_v46 = vpop.permute.xlu0 %45 }
  0x75   :  { %1649 = vst [vmem:[#allocation9_spill] sm:$0xff] %v1085_v32  ;;  %v148_v52 = vmul.f32 %v986_v29, %v1087_v46  ;;  %v149_v53 = vmul.f32 %v988_v30, %v1087_v46  ;;  %v150_v54 = vmul.f32 %v990_v31, %v1087_v46  ;;  %v151_v56 = vmul.f32 %v998_v36, %v1087_v46 }
  0x76   :  { %1650 = vst [vmem:[#allocation10_spill] sm:$0xff] %v1087_v46  ;;  %v132_v57 = vmul.f32 %v986_v29, %v1085_v32  ;;  %v133_v58 = vmul.f32 %v988_v30, %v1085_v32  ;;  %v134_v59 = vmul.f32 %v990_v31, %v1085_v32  ;;  %v135_v60 = vmul.f32 %v998_v36, %v1085_v32 }
  0x77   :  { %v152_v61 = vmul.f32 %v1004_v39, %v1087_v46  ;;  %v153_v62 = vmul.f32 %v1008_v41, %v1087_v46  ;;  %v154_v63 = vmul.f32 %v1012_v43, %v1087_v46  ;;  %v155_v29 = vmul.f32 %v1016_v45, %v1087_v46 }
  0x78   :  { %v1131_v0 = vpop.permute.xlu2 %367  ;;  %v136_v30 = vmul.f32 %v1004_v39, %v1085_v32  ;;  %v137_v31 = vmul.f32 %v1008_v41, %v1085_v32  ;;  %v138_v36 = vmul.f32 %v1012_v43, %v1085_v32  ;;  %v139_v39 = vmul.f32 %v1016_v45, %v1085_v32 }
  0x79   :  { %1651 = vst [vmem:[#allocation11_spill] sm:$0xff] %v1131_v0  ;;  %v1142_v1 = vadd.f32 %v1131_v0, %v308_v7  ;;  %v1145_v2 = vadd.f32 %v1131_v0, %v309_v13  ;;  %v1148_v3 = vadd.f32 %v1131_v0, %v310_v14  ;;  %v1151_v4 = vadd.f32 %v1131_v0, %v311_v15 }
  0x7a   :  { %v1156_v41 = vadd.f32 %v1131_v0, %v312_v16  ;;  %v1159_v43 = vadd.f32 %v1131_v0, %v313_v17  ;;  %v1162_v5 = vadd.f32 %v1131_v0, %v314_v18  ;;  %v1172_v16 = vadd.f32 %v1131_v0, %v315_v19 }
  0x7b   :  { %v1180_v7 = vmul.f32 %v1055_v8, %v1087_v46  ;;  %v1184_v13 = vmul.f32 %v1061_v20, %v1087_v46  ;;  %v1188_v45 = vmul.f32 %v1065_v22, %v1087_v46  ;;  %v1192_v19 = vmul.f32 %v1069_v24, %v1087_v46 }
  0x7c   :  { %1652 = vst [vmem:[#allocation12_spill] sm:$0xff] %v1156_v41 }
  0x7d   :  { %1653 = vst [vmem:[#allocation13_spill] sm:$0xff] %v1159_v43  ;;  %v1174_v17 = vpop.permute.xlu0 %177  ;;  %v1176_v18 = vpop.permute.xlu1 %173 }
  0x7e   :  { %1654 = vst [vmem:[#allocation14_spill] sm:$0xff] %v1162_v5  ;;  %v276_v15 = vmul.f32 %v992_v33, %v1174_v17  ;;  %v277_v14 = vmul.f32 %v994_v34, %v1174_v17  ;;  %v278_v10 = vmul.f32 %v996_v35, %v1174_v17  ;;  %v279_v6 = vmul.f32 %v1002_v38, %v1174_v17 }
  0x7f   :  { %1655 = vst [vmem:[#allocation15_spill] sm:$0xff] %v1188_v45  ;;  %v260_v12 = vmul.f32 %v992_v33, %v1176_v18  ;;  %v261_v0 = vmul.f32 %v994_v34, %v1176_v18  ;;  %v262_v46 = vmul.f32 %v996_v35, %v1176_v18  ;;  %v263_v5 = vmul.f32 %v1002_v38, %v1176_v18 }
  0x80   :  { %1656 = vst [vmem:[#allocation16_spill] sm:$0xff] %v1192_v19  ;;  %v340_v37 = vadd.f32 %v276_v15, %v148_v52  ;;  %v341_v43 = vadd.f32 %v277_v14, %v149_v53  ;;  %v342_v41 = vadd.f32 %v278_v10, %v150_v54  ;;  %v343_v11 = vadd.f32 %v279_v6, %v151_v56 }
  0x81   :  { %v1210_v24 = vadd.f32 %v260_v12, %v132_v57  ;;  %v1212_v22 = vadd.f32 %v261_v0, %v133_v58  ;;  %v1214_v20 = vadd.f32 %v262_v46, %v134_v59  ;;  %v1216_v8 = vadd.f32 %v263_v5, %v135_v60 }
  0x82   :  { %v280_v32 = vmul.f32 %v1006_v40, %v1174_v17  ;;  %v281_v19 = vmul.f32 %v1010_v42, %v1174_v17  ;;  %v282_v52 = vmul.f32 %v1014_v44, %v1174_v17  ;;  %v283_v53 = vmul.f32 %v1027_v50, %v1174_v17 }
  0x83   :  { %v264_v12 = vmul.f32 %v1006_v40, %v1176_v18  ;;  %v265_v46 = vmul.f32 %v1010_v42, %v1176_v18  ;;  %v266_v54 = vmul.f32 %v1014_v44, %v1176_v18  ;;  %v267_v56 = vmul.f32 %v1027_v50, %v1176_v18 }
  0x84   :  { %v344_v57 = vadd.f32 %v280_v32, %v152_v61  ;;  %v345_v58 = vadd.f32 %v281_v19, %v153_v62  ;;  %v346_v59 = vadd.f32 %v282_v52, %v154_v63  ;;  %v347_v60 = vadd.f32 %v283_v53, %v155_v29 }
  0x85   :  { %v1234_v0 = vpop.permute.xlu0 %165  ;;  %v1236_v5 = vadd.f32 %v264_v12, %v136_v30  ;;  %v1238_v6 = vadd.f32 %v265_v46, %v137_v31  ;;  %v1240_v10 = vadd.f32 %v266_v54, %v138_v36  ;;  %v1242_v14 = vadd.f32 %v267_v56, %v139_v39 }
  0x86   :  { %v1244_v15 = vpop.permute.xlu1 %377  ;;  %v228_v45 = vmul.f32 %v992_v33, %v1234_v0  ;;  %v229_v32 = vmul.f32 %v994_v34, %v1234_v0  ;;  %v230_v61 = vmul.f32 %v996_v35, %v1234_v0  ;;  %v231_v62 = vmul.f32 %v1002_v38, %v1234_v0 }
  0x87   :  { %v428_v63 = vadd.f32 %v1244_v15, %v340_v37  ;;  %v429_v29 = vadd.f32 %v1244_v15, %v341_v43  ;;  %v430_v30 = vadd.f32 %v1244_v15, %v342_v41  ;;  %v431_v31 = vadd.f32 %v1244_v15, %v343_v11 }
  0x88   :  { %v292_v36 = vadd.f32 %v228_v45, %v1073_v25  ;;  %v293_v33 = vadd.f32 %v229_v32, %v1077_v26  ;;  %v294_v34 = vadd.f32 %v230_v61, %v1081_v27  ;;  %v295_v39 = vadd.f32 %v231_v62, %v1091_v47 }
  0x89   :  { %v492_v35 = vmax.f32 %v428_v63, 0.0  ;;  %v493_v19 = vmax.f32 %v429_v29, 0.0  ;;  %v494_v52 = vmax.f32 %v430_v30, 0.0  ;;  %v495_v38 = vmax.f32 %v431_v31, 0.0 }
  0x8a   :  { %v1263_v37 = vadd.f32 %v1244_v15, %v344_v57  ;;  %v1266_v43 = vadd.f32 %v1244_v15, %v345_v58  ;;  %v1269_v11 = vadd.f32 %v1244_v15, %v346_v59  ;;  %v1272_v25 = vadd.f32 %v1244_v15, %v347_v60 }
  0x8b   :  { %531 = vmatpush.msra.mxu0 %v492_v35  ;;  %551 = vmatpush.msra.mxu1 %v493_v19  ;;  %v467_v26 = vmax.f32 %v1172_v16, 0.0  ;;  %v232_v27 = vmul.f32 %v1006_v40, %v1234_v0  ;;  %v233_v47 = vmul.f32 %v1010_v42, %v1234_v0  ;;  %v234_v41 = vmul.f32 %v1014_v44, %v1234_v0 }
  0x8c   :  { %571 = vmatpush.msra.mxu2 %v494_v52  ;;  %591 = vmatpush.msra.mxu3 %v495_v38  ;;  %v496_v45 = vmax.f32 %v1263_v37, 0.0  ;;  %v497_v53 = vmax.f32 %v1266_v43, 0.0  ;;  %v498_v12 = vmax.f32 %v1269_v11, 0.0  ;;  %v499_v46 = vmax.f32 %v1272_v25, 0.0  ;;  %v1666_v37 = vld [vmem:[#allocation7_spill] sm:$0xff] }
  0x8d   :  { %v296_v54 = vadd.f32 %v232_v27, %v1095_v48  ;;  %v297_v40 = vadd.f32 %v233_v47, %v1099_v49  ;;  %v298_v56 = vadd.f32 %v234_v41, %v1103_v51  ;;  %v235_v42 = vmul.f32 %v1027_v50, %v1234_v0 }
  0x8e   :  { %v1290_v44 = vpop.permute.xlu1 %372  ;;  %v1292_v57 = vpop.permute.xlu0 %362  ;;  %v284_v58 = vmul.f32 %v1057_v9, %v1174_v17  ;;  %v285_v59 = vmul.f32 %v1063_v21, %v1174_v17  ;;  %v286_v48 = vmul.f32 %v1067_v23, %v1174_v17  ;;  %v287_v49 = vmul.f32 %v1083_v28, %v1174_v17 }
  0x8f   :  { %v412_v50 = vadd.f32 %v1290_v44, %v1210_v24  ;;  %v413_v51 = vadd.f32 %v1290_v44, %v1212_v22  ;;  %v414_v60 = vadd.f32 %v1290_v44, %v1214_v20  ;;  %v415_v32 = vadd.f32 %v1290_v44, %v1216_v8  ;;  %v1317_v24 = vld [vmem:[%s1616_s0 + $0x18] sm:$0xff] }
  0x90   :  { %v380_v61 = vadd.f32 %v1292_v57, %v292_v36  ;;  %v381_v62 = vadd.f32 %v1292_v57, %v293_v33  ;;  %v382_v63 = vadd.f32 %v1292_v57, %v294_v34  ;;  %v383_v29 = vadd.f32 %v1292_v57, %v295_v39 }
  0x91   :  { %v476_v22 = vmax.f32 %v412_v50, 0.0  ;;  %v477_v30 = vmax.f32 %v413_v51, 0.0  ;;  %v478_v31 = vmax.f32 %v414_v60, 0.0  ;;  %v479_v20 = vmax.f32 %v415_v32, 0.0 }
  0x92   :  { %v444_v35 = vmax.f32 %v380_v61, 0.0  ;;  %v445_v19 = vmax.f32 %v381_v62, 0.0  ;;  %v446_v8 = vmax.f32 %v382_v63, 0.0  ;;  %v447_v52 = vmax.f32 %v383_v29, 0.0  ;;  %v1661_v62 = vld [vmem:[#allocation15_spill] sm:$0xff] }
  0x93   :  { %532 = vmatpush.msra.mxu0 %v476_v22  ;;  %552 = vmatpush.msra.mxu1 %v477_v30  ;;  %v416_v36 = vadd.f32 %v1290_v44, %v1236_v5  ;;  %v417_v33 = vadd.f32 %v1290_v44, %v1238_v6  ;;  %v1325_v34 = vadd.f32 %v1290_v44, %v1240_v10  ;;  %v64_v39 = vperm.slane %v1317_v24, 0  ;;  %v1662_v22 = vld [vmem:[#allocation16_spill] sm:$0xff] }
  0x94   :  { %572 = vmatpush.msra.mxu2 %v478_v31  ;;  %592 = vmatpush.msra.mxu3 %v479_v20  ;;  %v419_v38 = vadd.f32 %v1290_v44, %v1242_v14  ;;  %v1331_v27 = vadd.f32 %v1292_v57, %v296_v54  ;;  %v1334_v47 = vadd.f32 %v1292_v57, %v297_v40  ;;  %v192_v5 = vperm.slane %v1317_v24, 1  ;;  %v1663_v31 = vld [vmem:[#allocation9_spill] sm:$0xff]  ;;  %v1664_v20 = vld [vmem:[#allocation4_spill] sm:$0xff] }
  0x95   :  { %v1657_v6 = vmax.f32 %v1142_v1, 0.0  ;;  %v1658_v10 = vmax.f32 %v1145_v2, 0.0  ;;  %v480_v41 = vmax.f32 %v416_v36, 0.0  ;;  %v481_v50 = vmax.f32 %v417_v33, 0.0  ;;  %v1352_v1 = vld [vmem:[%s1617_s3] sm:$0x7] }
  0x96   :  { %v482_v51 = vmax.f32 %v1325_v34, 0.0  ;;  %v1343_v14 = vadd.f32 %v1292_v57, %v298_v56  ;;  %v1659_v54 = vmax.f32 %v1148_v3, 0.0  ;;  %v1660_v40 = vmax.f32 %v1151_v4, 0.0 }
  0x97   :  { %533 = vmatpush.msra.mxu0 %v1657_v6  ;;  %553 = vmatpush.msra.mxu1 %v1658_v10  ;;  %v483_v2 = vmax.f32 %v419_v38, 0.0  ;;  %v448_v60 = vmax.f32 %v1331_v27, 0.0  ;;  %v449_v32 = vmax.f32 %v1334_v47, 0.0  ;;  %v299_v61 = vadd.f32 %v235_v42, %v1113_v55  ;;  %v1667_v47 = vld [vmem:[#allocation8_spill] sm:$0xff]  ;;  %v1668_v6 = vld [vmem:[#allocation2_spill] sm:$0xff] }
  0x98   :  { %573 = vmatpush.msra.mxu2 %v1659_v54  ;;  %593 = vmatpush.msra.mxu3 %v1660_v40  ;;  %v450_v3 = vmax.f32 %v1343_v14, 0.0  ;;  %v348_v56 = vadd.f32 %v284_v58, %v1180_v7  ;;  %v349_v4 = vadd.f32 %v285_v59, %v1184_v13  ;;  %v350_v63 = vadd.f32 %v286_v48, %v1661_v62  ;;  %v1671_v40 = vld [vmem:[#allocation13_spill] sm:$0xff]  ;;  %v1673_v62 = vld [vmem:[#allocation3_spill] sm:$0xff] }
  0x99   :  { %534 = vmatpush.msra.mxu0 %v444_v35  ;;  %554 = vmatpush.msra.mxu1 %v445_v19  ;;  %v387_v29 = vadd.f32 %v1292_v57, %v299_v61  ;;  %v351_v30 = vadd.f32 %v287_v49, %v1662_v22  ;;  %v140_v36 = vmul.f32 %v1664_v20, %v1663_v31  ;;  %v1365_v55 = vperm.slane %v64_v39, 0  ;;  %v1665_v35 = vld [vmem:[#allocation6_spill] sm:$0xff] }
  0x9a   :  { %574 = vmatpush.msra.mxu2 %v446_v8  ;;  %594 = vmatpush.msra.mxu3 %v447_v52  ;;  %v436_v7 = vadd.f32 %v1244_v15, %v348_v56  ;;  %v437_v13 = vadd.f32 %v1244_v15, %v349_v4  ;;  %v438_v42 = vadd.f32 %v1244_v15, %v350_v63  ;;  %v1374_v58 = vperm.slane %v192_v5, 1  ;;  %v1674_v63 = vld [vmem:[#allocation14_spill] sm:$0xff] }
  0x9b   :  { %892 = vmatmul.msk.f32.vlgmr.msra.gmra.mxu0 %vm515_vm0, %v1352_v1  ;;  %893 = vmatmul.msk.f32.vlgmr.msra.gmra.mxu1 %vm515_vm0, %v1352_v1  ;;  %v451_v59 = vmax.f32 %v387_v29, 0.0  ;;  %v439_v48 = vadd.f32 %v1244_v15, %v351_v30  ;;  %v268_v49 = vmul.f32 %v1057_v9, %v1176_v18  ;;  %v141_v19 = vmul.f32 %v1665_v35, %v1663_v31 }
  0x9c   :  { %894 = vmatmul.msk.f32.vlgmr.msra.gmra.mxu2 %vm515_vm0, %v1352_v1  ;;  %895 = vmatmul.msk.f32.vlgmr.msra.gmra.mxu3 %vm515_vm0, %v1352_v1  ;;  %v500_v8 = vmax.f32 %v436_v7, 0.0  ;;  %v501_v52 = vmax.f32 %v437_v13, 0.0  ;;  %v502_v33 = vmax.f32 %v438_v42, 0.0  ;;  %v269_v34 = vmul.f32 %v1063_v21, %v1176_v18 }
  0x9d   :  { %611 = vmatpush.msrb.mxu0 %v496_v45  ;;  %631 = vmatpush.msrb.mxu1 %v497_v53  ;;  %v503_v39 = vmax.f32 %v439_v48, 0.0  ;;  %v332_v38 = vadd.f32 %v268_v49, %v140_v36  ;;  %v142_v45 = vmul.f32 %v1666_v37, %v1663_v31  ;;  %v270_v43 = vmul.f32 %v1067_v23, %v1176_v18 }
  0x9e   :  { %651 = vmatpush.msrb.mxu2 %v498_v12  ;;  %671 = vmatpush.msrb.mxu3 %v499_v46  ;;  %v333_v53 = vadd.f32 %v269_v34, %v141_v19  ;;  %v143_v5 = vmul.f32 %v1667_v47, %v1663_v31  ;;  %v271_v11 = vmul.f32 %v1083_v28, %v1176_v18  ;;  %v65_v25 = vperm.slane %v1317_v24, 2 }
  0x9f   :  { %612 = vmatpush.msrb.mxu0 %v480_v41  ;;  %632 = vmatpush.msrb.mxu1 %v481_v50  ;;  %v420_v12 = vadd.f32 %v1290_v44, %v332_v38  ;;  %v334_v46 = vadd.f32 %v270_v43, %v142_v45  ;;  %v124_v10 = vmul.f32 %v1664_v20, %v1668_v6  ;;  %v193_v41 = vperm.slane %v1317_v24, 3  ;;  %v1669_v50 = vld [vmem:[#allocation12_spill] sm:$0xff]  ;;  %v1677_v45 = vld [vmem:[#allocation5_spill] sm:$0xff] }
  0xa0   :  { %652 = vmatpush.msrb.mxu2 %v482_v51  ;;  %672 = vmatpush.msrb.mxu3 %v483_v2  ;;  %v1670_v54 = vmax.f32 %v1669_v50, 0.0  ;;  %v1672_v61 = vmax.f32 %v1671_v40, 0.0  ;;  %v421_v56 = vadd.f32 %v1290_v44, %v333_v53  ;;  %v335_v4 = vadd.f32 %v271_v11, %v143_v5 }
  0xa1   :  { %v252_v51 = vmul.f32 %v1057_v9, %v1673_v62  ;;  %v1415_v2 = vperm.slane %v65_v25, 0  ;;  %v1675_v29 = vmax.f32 %v1674_v63, 0.0  ;;  %v484_v22 = vmax.f32 %v420_v12, 0.0 }
  0xa2   :  { %613 = vmatpush.msrb.mxu0 %v1670_v54  ;;  %633 = vmatpush.msrb.mxu1 %v1672_v61  ;;  %v422_v30 = vadd.f32 %v1290_v44, %v334_v46  ;;  %v125_v36 = vmul.f32 %v1665_v35, %v1668_v6  ;;  %v253_v7 = vmul.f32 %v1063_v21, %v1673_v62  ;;  %v485_v13 = vmax.f32 %v421_v56, 0.0 }
  0xa3   :  { %653 = vmatpush.msrb.mxu2 %v1675_v29  ;;  %673 = vmatpush.msrb.mxu3 %v467_v26  ;;  %v423_v42 = vadd.f32 %v1290_v44, %v335_v4  ;;  %v316_v48 = vadd.f32 %v252_v51, %v124_v10  ;;  %v126_v16 = vmul.f32 %v1666_v37, %v1668_v6  ;;  %v1445_v53 = vperm.slane %v193_v41, 1 }
  0xa4   :  { %614 = vmatpush.msrb.mxu0 %v448_v60  ;;  %634 = vmatpush.msrb.mxu1 %v449_v32  ;;  %v486_v26 = vmax.f32 %v422_v30, 0.0  ;;  %v317_v49 = vadd.f32 %v253_v7, %v125_v36  ;;  %v254_v19 = vmul.f32 %v1067_v23, %v1673_v62  ;;  %v127_v27 = vmul.f32 %v1667_v47, %v1668_v6  ;;  %v1676_v32 = vld [vmem:[#allocation11_spill] sm:$0xff] }
  0xa5   :  { %654 = vmatpush.msrb.mxu2 %v450_v3  ;;  %674 = vmatpush.msrb.mxu3 %v451_v59  ;;  %v487_v60 = vmax.f32 %v423_v42, 0.0  ;;  %v404_v34 = vadd.f32 %v1676_v32, %v316_v48  ;;  %v255_v38 = vmul.f32 %v1083_v28, %v1673_v62  ;;  %v108_v14 = vmul.f32 %v1664_v20, %v1677_v45 }
  0xa6   :  { %691 = vmatpush.msra.mxu0 %v500_v8  ;;  %711 = vmatpush.msra.mxu1 %v501_v52  ;;  %v405_v3 = vadd.f32 %v1676_v32, %v317_v49  ;;  %v318_v59 = vadd.f32 %v254_v19, %v126_v16  ;;  %v236_v43 = vmul.f32 %v1057_v9, %v1234_v0  ;;  %v66_v12 = vperm.slane %v1317_v24, 4 }
  0xa7   :  { %731 = vmatpush.msra.mxu2 %v502_v33  ;;  %751 = vmatpush.msra.mxu3 %v503_v39  ;;  %v468_v8 = vmax.f32 %v404_v34, 0.0  ;;  %v319_v52 = vadd.f32 %v255_v38, %v127_v27  ;;  %v109_v20 = vmul.f32 %v1665_v35, %v1677_v45  ;;  %v237_v33 = vmul.f32 %v1063_v21, %v1234_v0 }
  0xa8   :  { %896 = vmatmul.msk.f32.vlgmr.msrb.gmra.mxu0 %vm515_vm0, %v1352_v1  ;;  %897 = vmatmul.msk.f32.vlgmr.msrb.gmra.mxu1 %vm515_vm0, %v1352_v1  ;;  %v469_v9 = vmax.f32 %v405_v3, 0.0  ;;  %v406_v39 = vadd.f32 %v1676_v32, %v318_v59  ;;  %v300_v5 = vadd.f32 %v236_v43, %v108_v14  ;;  %v110_v11 = vmul.f32 %v1666_v37, %v1677_v45 }
  0xa9   :  { %898 = vmatmul.msk.f32.vlgmr.msrb.gmra.mxu2 %vm515_vm0, %v1352_v1  ;;  %899 = vmatmul.msk.f32.vlgmr.msrb.gmra.mxu3 %vm515_vm0, %v1352_v1  ;;  %v407_v35 = vadd.f32 %v1676_v32, %v319_v52  ;;  %v301_v25 = vadd.f32 %v237_v33, %v109_v20  ;;  %v238_v21 = vmul.f32 %v1067_v23, %v1234_v0  ;;  %v1678_v23 = vld [vmem:[#allocation10_spill] sm:$0xff]  ;;  %v194_v7 = vperm.slane %v1317_v24, 5 }
  0xaa   :  { %692 = vmatpush.msra.mxu0 %v484_v22  ;;  %712 = vmatpush.msra.mxu1 %v485_v13  ;;  %v470_v46 = vmax.f32 %v406_v39, 0.0  ;;  %v388_v10 = vadd.f32 %v1292_v57, %v300_v5  ;;  %v111_v41 = vmul.f32 %v1667_v47, %v1677_v45  ;;  %v239_v37 = vmul.f32 %v1083_v28, %v1234_v0 }
  0xab   :  { %732 = vmatpush.msra.mxu2 %v486_v26  ;;  %752 = vmatpush.msra.mxu3 %v487_v60  ;;  %v471_v50 = vmax.f32 %v407_v35, 0.0  ;;  %v389_v54 = vadd.f32 %v1292_v57, %v301_v25  ;;  %v302_v40 = vadd.f32 %v238_v21, %v110_v11  ;;  %v160_v61 = vmul.f32 %v1365_v55, %v1678_v23 }
  0xac   :  { %693 = vmatpush.msra.mxu0 %v468_v8  ;;  %713 = vmatpush.msra.mxu1 %v469_v9  ;;  %v452_v56 = vmax.f32 %v388_v10, 0.0  ;;  %v303_v4 = vadd.f32 %v239_v37, %v111_v41  ;;  %v288_v51 = vmul.f32 %v1374_v58, %v1174_v17  ;;  %v161_v47 = vmul.f32 %v1415_v2, %v1678_v23 }
  0xad   :  { %733 = vmatpush.msra.mxu2 %v470_v46  ;;  %753 = vmatpush.msra.mxu3 %v471_v50  ;;  %v453_v28 = vmax.f32 %v389_v54, 0.0  ;;  %v390_v63 = vadd.f32 %v1292_v57, %v302_v40  ;;  %v289_v29 = vmul.f32 %v1445_v53, %v1174_v17  ;;  %v1481_v22 = vperm.slane %v66_v12, 0 }
  0xae   :  { %694 = vmatpush.msra.mxu0 %v452_v56  ;;  %v391_v30 = vadd.f32 %v1292_v57, %v303_v4  ;;  %v352_v36 = vadd.f32 %v288_v51, %v160_v61  ;;  %v67_v13 = vperm.slane %v1317_v24, 6  ;;  %v195_v26 = vperm.slane %v1317_v24, 7 }
  0xaf   :  { %714 = vmatpush.msra.mxu1 %v453_v28  ;;  %v454_v42 = vmax.f32 %v390_v63, 0.0  ;;  %v353_v48 = vadd.f32 %v289_v29, %v161_v47  ;;  %v162_v16 = vmul.f32 %v1481_v22, %v1678_v23  ;;  %v1492_v27 = vperm.slane %v194_v7, 1 }
  0xb0   :  { %900 = vmatmul.msk.f32.vlgmr.msra.gmra.mxu0 %vm515_vm0, %v1352_v1  ;;  %v455_v49 = vmax.f32 %v391_v30, 0.0  ;;  %v440_v19 = vadd.f32 %v1244_v15, %v352_v36  ;;  %v1494_v60 = vperm.slane %v67_v13, 0  ;;  %901 = vmatmul.msk.f32.vlgmr.msra.gmra.mxu1 %vm515_vm0, %v1352_v1  ;;  %v1499_v38 = vperm.slane %v195_v26, 1 }
  0xb1   :  { %734 = vmatpush.msra.mxu2 %v454_v42  ;;  %v441_v34 = vadd.f32 %v1244_v15, %v353_v48  ;;  %v144_v24 = vmul.f32 %v1365_v55, %v1663_v31  ;;  %v272_v14 = vmul.f32 %v1374_v58, %v1176_v18  ;;  %v290_v59 = vmul.f32 %v1492_v27, %v1174_v17 }
  0xb2   :  { %754 = vmatpush.msra.mxu3 %v455_v49  ;;  %v504_v3 = vmax.f32 %v440_v19, 0.0  ;;  %v163_v43 = vmul.f32 %v1494_v60, %v1678_v23  ;;  %902 = vmatmul.msk.f32.vlgmr.msra.gmra.mxu2 %vm515_vm0, %v1352_v1  ;;  %v145_v8 = vmul.f32 %v1415_v2, %v1663_v31  ;;  %v291_v20 = vmul.f32 %v1499_v38, %v1174_v17 }
  0xb3   :  { %v505_v52 = vmax.f32 %v441_v34, 0.0  ;;  %903 = vmatmul.msk.f32.vlgmr.msra.gmra.mxu3 %vm515_vm0, %v1352_v1  ;;  %v336_v33 = vadd.f32 %v272_v14, %v144_v24  ;;  %v273_v9 = vmul.f32 %v1445_v53, %v1176_v18  ;;  %v354_v39 = vadd.f32 %v290_v59, %v162_v16 }
  0xb4   :  { %771 = vmatpush.msrb.mxu0 %v504_v3  ;;  %v146_v5 = vmul.f32 %v1481_v22, %v1663_v31  ;;  %v274_v11 = vmul.f32 %v1492_v27, %v1176_v18  ;;  %v147_v35 = vmul.f32 %v1494_v60, %v1663_v31  ;;  %v355_v17 = vadd.f32 %v291_v20, %v163_v43 }
  0xb5   :  { %791 = vmatpush.msrb.mxu1 %v505_v52  ;;  %v424_v25 = vadd.f32 %v1290_v44, %v336_v33  ;;  %v337_v21 = vadd.f32 %v273_v9, %v145_v8  ;;  %v275_v12 = vmul.f32 %v1499_v38, %v1176_v18  ;;  %v442_v46 = vadd.f32 %v1244_v15, %v354_v39 }
  0xb6   :  { %v338_v10 = vadd.f32 %v274_v11, %v146_v5  ;;  %v128_v41 = vmul.f32 %v1365_v55, %v1668_v6  ;;  %v256_v37 = vmul.f32 %v1374_v58, %v1673_v62  ;;  %v443_v50 = vadd.f32 %v1244_v15, %v355_v17 }
  0xb7   :  { %v488_v31 = vmax.f32 %v424_v25, 0.0  ;;  %v425_v54 = vadd.f32 %v1290_v44, %v337_v21  ;;  %v339_v40 = vadd.f32 %v275_v12, %v147_v35  ;;  %v506_v23 = vmax.f32 %v442_v46, 0.0 }
  0xb8   :  { %v426_v61 = vadd.f32 %v1290_v44, %v338_v10  ;;  %v320_v56 = vadd.f32 %v256_v37, %v128_v41  ;;  %v129_v18 = vmul.f32 %v1415_v2, %v1668_v6  ;;  %v507_v4 = vmax.f32 %v443_v50, 0.0 }
  0xb9   :  { %772 = vmatpush.msrb.mxu0 %v488_v31  ;;  %v489_v51 = vmax.f32 %v425_v54, 0.0  ;;  %v427_v47 = vadd.f32 %v1290_v44, %v339_v40  ;;  %v257_v28 = vmul.f32 %v1445_v53, %v1673_v62  ;;  %811 = vmatpush.msrb.mxu2 %v506_v23  ;;  %v130_v29 = vmul.f32 %v1481_v22, %v1668_v6 }
  0xba   :  { %v490_v15 = vmax.f32 %v426_v61, 0.0  ;;  %v408_v63 = vadd.f32 %v1676_v32, %v320_v56  ;;  %v258_v30 = vmul.f32 %v1492_v27, %v1673_v62  ;;  %831 = vmatpush.msrb.mxu3 %v507_v4  ;;  %v131_v44 = vmul.f32 %v1494_v60, %v1668_v6 }
  0xbb   :  { %792 = vmatpush.msrb.mxu1 %v489_v51  ;;  %v491_v36 = vmax.f32 %v427_v47, 0.0  ;;  %v321_v7 = vadd.f32 %v257_v28, %v129_v18  ;;  %v259_v13 = vmul.f32 %v1499_v38, %v1673_v62  ;;  %v112_v16 = vmul.f32 %v1365_v55, %v1677_v45 }
  0xbc   :  { %812 = vmatpush.msrb.mxu2 %v490_v15  ;;  %v472_v42 = vmax.f32 %v408_v63, 0.0  ;;  %v322_v48 = vadd.f32 %v258_v30, %v130_v29  ;;  %v240_v26 = vmul.f32 %v1374_v58, %v1234_v0  ;;  %v113_v34 = vmul.f32 %v1415_v2, %v1677_v45 }
  0xbd   :  { %832 = vmatpush.msrb.mxu3 %v491_v36  ;;  %v409_v49 = vadd.f32 %v1676_v32, %v321_v7  ;;  %v323_v19 = vadd.f32 %v259_v13, %v131_v44  ;;  %v241_v6 = vmul.f32 %v1445_v53, %v1234_v0  ;;  %v114_v55 = vmul.f32 %v1481_v22, %v1677_v45 }
  0xbe   :  { %773 = vmatpush.msrb.mxu0 %v472_v42  ;;  %v410_v62 = vadd.f32 %v1676_v32, %v322_v48  ;;  %v304_v24 = vadd.f32 %v240_v26, %v112_v16  ;;  %v242_v58 = vmul.f32 %v1492_v27, %v1234_v0  ;;  %v115_v2 = vmul.f32 %v1494_v60, %v1677_v45 }
  0xbf   :  { %v473_v14 = vmax.f32 %v409_v49, 0.0  ;;  %v411_v3 = vadd.f32 %v1676_v32, %v323_v19  ;;  %v305_v59 = vadd.f32 %v241_v6, %v113_v34  ;;  %v243_v52 = vmul.f32 %v1499_v38, %v1234_v0  ;;  %v513_v38 = vpop.permute.xlu1 %512 }
  0xc0   :  { %v474_v43 = vmax.f32 %v410_v62, 0.0  ;;  %v392_v53 = vadd.f32 %v1292_v57, %v304_v24  ;;  %v306_v8 = vadd.f32 %v242_v58, %v114_v55 }
  0xc1   :  { %793 = vmatpush.msrb.mxu1 %v473_v14  ;;  %v475_v20 = vmax.f32 %v411_v3, 0.0  ;;  %v393_v22 = vadd.f32 %v1292_v57, %v305_v59  ;;  %v307_v32 = vadd.f32 %v243_v52, %v115_v2 }
  0xc2   :  { %813 = vmatpush.msrb.mxu2 %v474_v43  ;;  %v456_v27 = vmax.f32 %v392_v53, 0.0  ;;  %v394_v33 = vadd.f32 %v1292_v57, %v306_v8 }
  0xc3   :  { %833 = vmatpush.msrb.mxu3 %v475_v20  ;;  %v457_v9 = vmax.f32 %v393_v22, 0.0  ;;  %v395_v60 = vadd.f32 %v1292_v57, %v307_v32 }
  0xc4   :  { %774 = vmatpush.msrb.mxu0 %v456_v27  ;;  %v458_v45 = vmax.f32 %v394_v33, 0.0 }
  0xc5   :  { %794 = vmatpush.msrb.mxu1 %v457_v9  ;;  %904 = vmatmul.msk.f32.vlgmr.msrb.gmra.mxu0 %vm515_vm0, %v1352_v1  ;;  %v459_v0 = vmax.f32 %v395_v60, 0.0 }
  0xc6   :  { %814 = vmatpush.msrb.mxu2 %v458_v45  ;;  %905 = vmatmul.msk.f32.vlgmr.msrb.gmra.mxu1 %vm515_vm0, %v1352_v1 }
  0xc7   :  { %906 = vmatmul.msk.f32.vlgmr.msrb.gmra.mxu2 %vm515_vm0, %v1352_v1  ;;  %834 = vmatpush.msrb.mxu3 %v459_v0 }
  0xc8   :  { %907 = vmatmul.msk.f32.vlgmr.msrb.gmra.mxu3 %vm515_vm0, %v1352_v1 }
 0x118   :  { %v536_v39 = vpop.f32.mrf.mxu0  ;;  %v556_v5 = vpop.f32.mrf.mxu1 }
 0x119   :  { %v557_v57 = vadd.f32 %v556_v5, %v513_v38  ;;  %v537_v11 = vadd.f32 %v536_v39, %v513_v38 }
 0x11b   :  { %v855_v35 = vrot.slane %v557_v57, 4 }
 0x11d   :  { %v864_v17 = vsel %vm863_vm1, %v537_v11, %v855_v35 }
 0x11e   :  { %880 = vst [vmem:[%s1618_s5] sm:$0x77] %v864_v17 }
 0x11f   :  { %v576_v25 = vpop.f32.mrf.mxu2  ;;  %v596_v21 = vpop.f32.mrf.mxu3 }
 0x120   :  { %v597_v12 = vadd.f32 %v596_v21, %v513_v38  ;;  %v577_v46 = vadd.f32 %v576_v25, %v513_v38 }
 0x122   :  { %v856_v10 = vrot.slane %v597_v12, 4 }
 0x124   :  { %v865_v1 = vsel %vm863_vm1, %v577_v46, %v856_v10 }
 0x125   :  { %v616_v41 = vpop.f32.mrf.mxu0  ;;  %v636_v37 = vpop.f32.mrf.mxu1  ;;  %881 = vst [vmem:[%s1618_s5 + $0x8] sm:$0x77] %v865_v1 }
 0x126   :  { %v637_v50 = vadd.f32 %v636_v37, %v513_v38  ;;  %v617_v31 = vadd.f32 %v616_v41, %v513_v38 }
 0x128   :  { %v857_v54 = vrot.slane %v637_v50, 4 }
 0x12a   :  { %v866_v40 = vsel %vm863_vm1, %v617_v31, %v857_v54 }
 0x12b   :  { %882 = vst [vmem:[%s1618_s5 + $0x10] sm:$0x77] %v866_v40 }
 0x12c   :  { %v656_v23 = vpop.f32.mrf.mxu2  ;;  %v676_v61 = vpop.f32.mrf.mxu3 }
 0x12d   :  { %v677_v56 = vadd.f32 %v676_v61, %v513_v38  ;;  %v696_v18 = vpop.f32.mrf.mxu0  ;;  %v716_v4 = vpop.f32.mrf.mxu1  ;;  %v657_v51 = vadd.f32 %v656_v23, %v513_v38 }
 0x12e   :  { %v717_v28 = vadd.f32 %v716_v4, %v513_v38  ;;  %v697_v63 = vadd.f32 %v696_v18, %v513_v38 }
 0x12f   :  { %v858_v47 = vrot.slane %v677_v56, 4 }
 0x130   :  { %v859_v29 = vrot.slane %v717_v28, 4 }
 0x131   :  { %v867_v15 = vsel %vm863_vm1, %v657_v51, %v858_v47 }
 0x132   :  { %883 = vst [vmem:[%s1618_s5 + $0x18] sm:$0x77] %v867_v15  ;;  %v868_v30 = vsel %vm863_vm1, %v697_v63, %v859_v29 }
 0x133   :  { %884 = vst [vmem:[%s1618_s5 + $0x20] sm:$0x77] %v868_v30 }
 0x135   :  { %v736_v36 = vpop.f32.mrf.mxu2 }
 0x136   :  { %v756_v7 = vpop.f32.mrf.mxu3  ;;  %v737_v13 = vadd.f32 %v736_v36, %v513_v38 }
 0x137   :  { %v757_v44 = vadd.f32 %v756_v7, %v513_v38 }
 0x139   :  { %v860_v42 = vrot.slane %v757_v44, 4 }
 0x13b   :  { %v869_v48 = vsel %vm863_vm1, %v737_v13, %v860_v42 }
 0x13c   :  { %885 = vst [vmem:[%s1618_s5 + $0x28] sm:$0x77] %v869_v48 }
 0x142   :  { %v776_v16 = vpop.f32.mrf.mxu0 }
 0x143   :  { %v796_v26 = vpop.f32.mrf.mxu1  ;;  %v777_v19 = vadd.f32 %v776_v16, %v513_v38 }
 0x144   :  { %v797_v49 = vadd.f32 %v796_v26, %v513_v38 }
 0x146   :  { %v861_v34 = vrot.slane %v797_v49, 4 }
 0x148   :  { %v870_v6 = vsel %vm863_vm1, %v777_v19, %v861_v34 }
 0x149   :  { %886 = vst [vmem:[%s1618_s5 + $0x30] sm:$0x77] %v870_v6 }
 0x14a   :  { %v816_v62 = vpop.f32.mrf.mxu2 }
 0x14b   :  { %v836_v24 = vpop.f32.mrf.mxu3  ;;  %v817_v58 = vadd.f32 %v816_v62, %v513_v38 }
 0x14c   :  { %v837_v55 = vadd.f32 %v836_v24, %v513_v38 }
 0x14e   :  { %v862_v14 = vrot.slane %v837_v55, 4 }
 0x150   :  { %v871_v3 = vsel %vm863_vm1, %v817_v58, %v862_v14 }
 0x151   :  { %887 = vst [vmem:[%s1618_s5 + $0x38] sm:$0x77] %v871_v3 }

</bundles_post_ra>
